<compile_context>
chip_gen: v5e
topology: v5e:2x2
jax: 0.10.0
libtpu: 0.0.40
codegen_flags: <defaults>
</compile_context>

<pallas_src>
import jax
import jax.numpy as jnp
from jax.experimental import pallas as pl
from jax.experimental.pallas import tpu as pltpu


# ----------------------------------------------------------------------------
# Positional encoding table (constant, computed once host-side).
# ----------------------------------------------------------------------------
def sinusoidal_positional_encoding(seq_len: int, d_model: int) -> jnp.ndarray:
    pos = jnp.arange(seq_len, dtype=jnp.float32)[:, None]           # [L, 1]
    idx = jnp.arange(d_model, dtype=jnp.float32)[None, :]           # [1, D]
    angle_rates = 1.0 / jnp.power(
        10000.0, (2.0 * jnp.floor(idx / 2.0)) / float(d_model))
    angles = pos * angle_rates                                      # [L, D]
    even_mask = (jnp.arange(d_model) % 2) == 0
    return jnp.where(even_mask[None, :], jnp.sin(angles), jnp.cos(angles))


# ----------------------------------------------------------------------------
# Pallas kernel: one block of batch rows per grid step.
#   x_ref : [Bb, 2N]  bf16  flattened (node, coord) inputs
#   w_ref : [2N, C]   bf16  fused weight matrix (batch-invariant)
#   b_ref : [1, C]    f32   fused bias (bd + alpha*proj(PE)/n_agents, bc)
#   o_ref : [Bb, C]         lane-dense output block, C = out_rows * E
# ----------------------------------------------------------------------------
def _city_embedding_kernel(x_ref, w_ref, b_ref, o_ref):
    o_ref[...] = (
        jnp.dot(x_ref[...], w_ref[...], preferred_element_type=jnp.float32)
        + b_ref[...]
    ).astype(o_ref.dtype)


# ----------------------------------------------------------------------------
# Batch-invariant setup (plain JAX, call ONCE and reuse): fused weight + bias.
# Hoists the E x E positional projection, the alpha / n_agents scaling, the
# depot/city row routing, and the bf16 cast out of the hot path.
# ----------------------------------------------------------------------------
def build_city_embedding_params(params, n_agents: int, n_nodes: int,
                                *, compute_dtype=jnp.bfloat16):
    E = params["bd"].shape[0]
    A = n_agents + 1
    out_rows = A + (n_nodes - 1)
    C = out_rows * E

    pe = sinusoidal_positional_encoding(A, E).astype(jnp.float32)       # [A, E]
    pos_term = (params["alpha"][0]
                * (pe @ params["wp"].T + params["bp"])
                / float(n_agents))                                      # [A, E]

    # Per-output-row bias: depot rows get (bd + pos_term), city rows get bc.
    bias_rows = jnp.concatenate(
        [params["bd"][None, :] + pos_term,
         jnp.broadcast_to(params["bc"][None, :], (n_nodes - 1, E))],
        axis=0)                                                         # [out_rows, E]
    bias_flat = bias_rows.reshape(1, C).astype(jnp.float32)

    # Per-output-row [2, E] weight slab (depot rows Wd^T, city rows Wc^T),
    # scattered by source node into a fused [2N, C] weight matrix so that
    # out_flat = city_flat @ W_fused + bias_flat reproduces the module output.
    rows = jnp.arange(out_rows)
    node = jnp.where(rows < A, 0, rows - (A - 1))                       # [out_rows]
    w_rows = jnp.where((rows < A)[:, None, None],
                       params["wd"].T[None],                            # [1, 2, E]
                       params["wc"].T[None])                            # [out_rows, 2, E]
    onehot = (node[:, None] == jnp.arange(n_nodes)[None, :]).astype(jnp.float32)
    w_fused = jnp.einsum("rn,rje->njre", onehot, w_rows)                # [N, 2, out_rows, E]
    w_fused = w_fused.reshape(2 * n_nodes, C).astype(compute_dtype)

    return dict(w_fused=w_fused, bias_flat=bias_flat, out_rows=out_rows,
                embed_dim=E, n_nodes=n_nodes, compute_dtype=compute_dtype)


# ----------------------------------------------------------------------------
# Batch block-size selection.
# ----------------------------------------------------------------------------
def _round_up(x: int, m: int) -> int:
    return ((x + m - 1) // m) * m


def _pick_block_b(batch: int, cap: int = 1024) -> int:
    if batch < 128:
        # One grid step; block second-minor extent == full batch dim is always
        # layout-legal and avoids any masking.  Splitting tiny batches only
        # adds per-step overhead.
        return batch
    # >= 2 grid steps so the "parallel" axis can shard across both v7x
    # TensorCores; each step capped at `cap` rows (VMEM: double-buffered
    # output = 2 * cap * C * 4B).  Multiple of 16 for bf16 sublane packing.
    nsteps = max(2, pl.cdiv(batch, cap))
    return min(cap, _round_up(pl.cdiv(batch, nsteps), 16))


# ----------------------------------------------------------------------------
# Forward wrapper (hot path).  `fused` comes from build_city_embedding_params.
# ----------------------------------------------------------------------------
def city_embedding_forward(city, fused, *, out_dtype=jnp.float32,
                           block_cap: int = 1024):
    """city: [B, N, 2].  Returns [B, n_agents + N, E] in `out_dtype`."""
    B, N, input_dim = city.shape
    assert input_dim == 2
    assert N == fused["n_nodes"]

    out_rows = fused["out_rows"]
    E = fused["embed_dim"]
    C = out_rows * E
    compute_dtype = fused["compute_dtype"]

    # [B, 2N] flattened coords (row-major reshape is free); bf16 for a
    # single-pass MXU matmul and half the input DMA traffic.
    x_flat = city.reshape(B, N * input_dim).astype(compute_dtype)

    block_b = _pick_block_b(B, block_cap)
    grid = (pl.cdiv(B, block_b),)   # partial trailing block is masked by Pallas

    # NOTE: W_fused / bias are revisited every step (index_map -> (0,0)); at
    # N=16 their double-buffered VMEM is ~80 KB so pl.Buffered(1) is skipped
    # as negligible here (revisit if N/E grow).
    grid_spec = pltpu.PrefetchScalarGridSpec(
        num_scalar_prefetch=0,
        grid=grid,
        in_specs=[
            pl.BlockSpec((block_b, N * input_dim), lambda b: (b, 0)),   # x
            pl.BlockSpec((N * input_dim, C), lambda b: (0, 0)),         # W_fused
            pl.BlockSpec((1, C), lambda b: (0, 0)),                     # bias
        ],
        out_specs=pl.BlockSpec((block_b, C), lambda b: (b, 0)),         # lane-dense
    )

    out_flat = pl.pallas_call(
        _city_embedding_kernel,
        out_shape=jax.ShapeDtypeStruct((B, C), out_dtype),
        grid_spec=grid_spec,
        compiler_params=pltpu.CompilerParams(
            dimension_semantics=("parallel",)),
    )(x_flat, fused["w_fused"], fused["bias_flat"])

    return out_flat.reshape(B, out_rows, E)


# ----------------------------------------------------------------------------
# Pure-JAX f32 reference (mirrors the PyTorch forward) for verification.
# ----------------------------------------------------------------------------
def city_embedding_ref(city, params, n_agents: int):
    B, N, _ = city.shape
    E = params["bd"].shape[0]
    A = n_agents + 1
    pe = sinusoidal_positional_encoding(A, E)
    depot = city[:, 0:1] @ params["wd"].T + params["bd"]           # [B,1,E]
    cities = city[:, 1:] @ params["wc"].T + params["bc"]           # [B,N-1,E]
    pos = params["alpha"][0] * (pe @ params["wp"].T + params["bp"]) / n_agents
    depot_rep = jnp.broadcast_to(depot, (B, A, E))
    depot_pos = depot_rep + pos[None]
    return jnp.concatenate([depot_pos, cities], axis=1)


# ----------------------------------------------------------------------------
if __name__ == "__main__":
    # Shapes consistent with the module: N=16 nodes, 2-D coords, embed_dim=32,
    # n_agents=4  ->  output [B, 20, 32], lane dim 20*32 = 640 = 5*128.
    N, input_dim, embed_dim, n_agents = 16, 2, 32, 4

    key = jax.random.PRNGKey(0)
    k_city, k_wd, k_bd, k_wc, k_bc, k_wp, k_bp, k_big = jax.random.split(key, 8)

    params = {
        "wd": 0.1 * jax.random.normal(k_wd, (embed_dim, input_dim), jnp.float32),
        "bd": 0.1 * jax.random.normal(k_bd, (embed_dim,), jnp.float32),
        "wc": 0.1 * jax.random.normal(k_wc, (embed_dim, input_dim), jnp.float32),
        "bc": 0.1 * jax.random.normal(k_bc, (embed_dim,), jnp.float32),
        "wp": 0.1 * jax.random.normal(k_wp, (embed_dim, embed_dim), jnp.float32),
        "bp": 0.1 * jax.random.normal(k_bp, (embed_dim,), jnp.float32),
        # Module initializes alpha to 0; use a nonzero deterministic value so
        # the positional-projection path is actually exercised.
        "alpha": jnp.array([0.25], dtype=jnp.float32),
    }

    # Build batch-invariant fused params ONCE (reused for every forward call).
    fused = build_city_embedding_params(params, n_agents, N)

    # --- check 1: small batch (single grid step, no masking) ----------------
    B = 2
    city = jax.random.uniform(k_city, (B, N, input_dim), dtype=jnp.float32)
    out = jax.block_until_ready(city_embedding_forward(city, fused))
    ref = city_embedding_ref(city, params, n_agents)
    assert out.shape == (B, n_agents + N, embed_dim), out.shape
    # bf16 LHS/RHS -> loosened tolerance vs the f32 reference.
    assert jnp.allclose(out, ref, atol=1e-2, rtol=1e-2), (
        float(jnp.max(jnp.abs(out - ref))))

    # --- check 2: larger batch (2 grid steps, partial trailing block) -------
    B2 = 200
    city2 = jax.random.uniform(k_big, (B2, N, input_dim), dtype=jnp.float32)
    out2 = jax.block_until_ready(city_embedding_forward(city2, fused))
    ref2 = city_embedding_ref(city2, params, n_agents)
    assert out2.shape == (B2, n_agents + N, embed_dim), out2.shape
    assert jnp.allclose(out2, ref2, atol=1e-2, rtol=1e-2), (
        float(jnp.max(jnp.abs(out2 - ref2))))

    print("KERNEL_OK")
</pallas_src>

<mosaic_0001>
module attributes {stable_mosaic.version = 11 : i64} {
  func.func @_city_embedding_kernel(%arg0: i32, %arg1: memref<2x32xbf16, #tpu.memory_space<vmem>>, %arg2: memref<32x640xbf16, #tpu.memory_space<vmem>>, %arg3: memref<1x640xf32, #tpu.memory_space<vmem>>, %arg4: memref<2x640xf32, #tpu.memory_space<vmem>>) attributes {dimension_semantics = [#tpu.dimension_semantics<parallel>], iteration_bounds = array<i64: 1>, scalar_prefetch = 0 : i64, scratch_operands = 0 : i64, tpu.core_type = #tpu.core_type<tc>, window_params = [{transform_indices = @transform_0, window_bounds = array<i64: 2, 32>}, {pipeline_mode = #tpu.pipeline_mode<synchronous>, transform_indices = @transform_1, window_bounds = array<i64: 32, 640>}, {pipeline_mode = #tpu.pipeline_mode<synchronous>, transform_indices = @transform_2, window_bounds = array<i64: 1, 640>}, {transform_indices = @transform_3, window_bounds = array<i64: 2, 640>}]} {
    %c0 = arith.constant 0 : index
    %c0_0 = arith.constant 0 : index
    %0 = vector.load %arg1[%c0, %c0_0] : memref<2x32xbf16, #tpu.memory_space<vmem>>, vector<2x32xbf16>
    %c0_1 = arith.constant 0 : index
    %c0_2 = arith.constant 0 : index
    %1 = vector.load %arg2[%c0_1, %c0_2] : memref<32x640xbf16, #tpu.memory_space<vmem>>, vector<32x640xbf16>
    %cst = arith.constant dense<0.000000e+00> : vector<2x640xf32>
    %2 = tpu.matmul %0, %1, %cst {dimension_numbers = #tpu.dot_dimension_numbers<[1], [0], [0], [1], [0, 0, 1, 1], [], []>} : vector<2x32xbf16>, vector<32x640xbf16>, vector<2x640xf32> -> vector<2x640xf32>
    %c0_3 = arith.constant 0 : index
    %c0_4 = arith.constant 0 : index
    %3 = vector.load %arg3[%c0_3, %c0_4] : memref<1x640xf32, #tpu.memory_space<vmem>>, vector<1x640xf32>
    %4 = vector.broadcast %3 : vector<1x640xf32> to vector<2x640xf32>
    %5 = arith.addf %2, %4 : vector<2x640xf32>
    %c0_5 = arith.constant 0 : index
    %c0_6 = arith.constant 0 : index
    %6 = vector.load %arg4[%c0_5, %c0_6] : memref<2x640xf32, #tpu.memory_space<vmem>>, vector<2x640xf32>
    tpu.vector_store %arg4[%c0_5, %c0_6], %5 {strides = array<i32>} : memref<2x640xf32, #tpu.memory_space<vmem>>, vector<2x640xf32>,
    return
  }
  func.func @transform_0(%arg0: i32) -> (i32, i32) {
    %c0_i32 = arith.constant 0 : i32
    %c0_i32_0 = arith.constant 0 : i32
    return %arg0, %c0_i32 : i32, i32
  }
  func.func @transform_1(%arg0: i32) -> (i32, i32) {
    %c0_i32 = arith.constant 0 : i32
    %c0_i32_0 = arith.constant 0 : i32
    %c0_i32_1 = arith.constant 0 : i32
    return %c0_i32, %c0_i32_0 : i32, i32
  }
  func.func @transform_2(%arg0: i32) -> (i32, i32) {
    %c0_i32 = arith.constant 0 : i32
    %c0_i32_0 = arith.constant 0 : i32
    %c0_i32_1 = arith.constant 0 : i32
    return %c0_i32, %c0_i32_0 : i32, i32
  }
  func.func @transform_3(%arg0: i32) -> (i32, i32) {
    %c0_i32 = arith.constant 0 : i32
    %c0_i32_0 = arith.constant 0 : i32
    return %arg0, %c0_i32 : i32, i32
  }
}

</mosaic_0001>

<bundles_post_ra>
// kernel: tpu_custom_call.1
= control target key start
LH: loop header
LB: loop body
LE: loop exit
PB: predicated region body
PF: predicated region fallthrough
CT: control target
= control target key end

     0   :  { %8 = vsyncpa [#allocation3], 0  ;;  %s440_s0 = inlined_call_operand.hbm [shape: bf16[2,32], index: 0, kind: input, shape index: {}]   ;;  %s441_s1 = inlined_call_operand.hbm [shape: bf16[32,640], index: 1, kind: input, shape index: {}]   ;;  %s442_s2 = inlined_call_operand.hbm [shape: f32[1,640], index: 2, kind: input, shape index: {}]   ;;  %s443_s3 = inlined_call_operand.hbm [shape: f32[2,640], index: 3, kind: output, shape index: {}]  }
   0x1   :  { %9 = vsyncpa [#allocation6], 0  ;;  %s26_s14 = sshll.u32 %s441_s1, 4  ;;  %s27_s14 = int_to_ptr.hbm [resolvable:$true] %s26_s14 }
   0x2   :  { %10 = vsyncpa [#allocation4], 0  ;;  %s402_s15 = smov [#allocation5]   ;;  %s16_s19 = sshll.u32 %s440_s0, 4  ;;  %s17_s19 = int_to_ptr.hbm [resolvable:$true] %s16_s19 }
   0x3   :  { %s28_s16 = sshll.u32 %s402_s15, 4  ;;  %s403_s20 = smov 320   ;;  %s29_s16 = int_to_ptr.vmem [resolvable:$true] %s28_s16 }
   0x4   :  { %s404_s21 = smov 20   ;;  %s405_s22 = smov [#allocation2]  }
   0x5   :  { %34 = dma.hbm_to_vmem [thread:$0]  %s27_s14, 1280, %s29_s16, [#allocation6], %s403_s20, %s403_s20, %s404_s21  }
   0x6   :  { %s18_s23 = sshll.u32 %s405_s22, 4  ;;  %s40_s26 = sshll.u32 %s442_s2, 4  ;;  %s19_s23 = int_to_ptr.vmem [resolvable:$true] %s18_s23  ;;  %s41_s26 = int_to_ptr.hbm [resolvable:$true] %s40_s26 }
   0x7   :  { %21 = dma.hbm_to_vmem [thread:$0]  %s17_s19, 16, %s19_s23, [#allocation3]  }
   0x8   :  { %s406_s1 = smov [#allocation7]  }
   0x9   :  { %s42_s27 = sshll.u32 %s406_s1, 4  ;;  %s43_s27 = int_to_ptr.vmem [resolvable:$true] %s42_s27 }
   0xa   :  { %45 = dma.hbm_to_vmem [thread:$0]  %s41_s26, 80, %s43_s27, [#allocation6]  }
   0xb   :  { %396 = dma.done.wait [#allocation3], 16  }
   0xc   :  { %397 = vsyncadd [#allocation3], 4294967280 }
   0xd   :  { %398 = dma.done.wait [#allocation6], 1360  }
   0xe   :  { %399 = vsyncadd [#allocation6], 4294965936  ;;  %v261_v0 = vld [vmem:[#allocation5 + $0x28] sm:$0xf]  ;;  %v291_v1 = vld [vmem:[#allocation5 + $0x38] sm:$0xf0] }
   0xf   :  { %v289_v2 = vld [vmem:[#allocation5 + $0x2c] sm:$0xf]  ;;  %v262_v3 = vor.u32 %v291_v1, %v261_v0  ;;  %v263_v4 = vld [vmem:[#allocation5 + $0x3c] sm:$0xf0]  ;;  %v269_v5 = vld [vmem:[#allocation5 + $0x30] sm:$0xf] }
  0x10   :  { %v292_v6 = vld [vmem:[#allocation5 + $0x40] sm:$0xf0]  ;;  %v266_v7 = vor.u32 %v289_v2, %v263_v4  ;;  %v290_v9 = vld [vmem:[#allocation5 + $0x34] sm:$0xf]  ;;  %v271_v10 = vld [vmem:[#allocation5 + $0x44] sm:$0xf0] }
  0x11   :  { %v270_v8 = vor.u32 %v292_v6, %v269_v5  ;;  %v241_v11 = vld [vmem:[#allocation5] sm:$0xf]  ;;  %146 = vmatpush.bf16.msra.mxu0 %v262_v3  ;;  %v274_v12 = vor.u32 %v290_v9, %v271_v10  ;;  %v286_v13 = vld [vmem:[#allocation5 + $0x10] sm:$0xf0]  ;;  %v284_v14 = vld [vmem:[#allocation5 + $0x4] sm:$0xf] }
  0x12   :  { %v243_v15 = vld [vmem:[#allocation5 + $0x14] sm:$0xf0]  ;;  %159 = vmatpush.bf16.msra.mxu1 %v266_v7  ;;  %v242_v16 = vor.u32 %v286_v13, %v241_v11  ;;  %v249_v18 = vld [vmem:[#allocation5 + $0x8] sm:$0xf]  ;;  %v287_v19 = vld [vmem:[#allocation5 + $0x18] sm:$0xf0] }
  0x13   :  { %172 = vmatpush.bf16.msra.mxu2 %v270_v8  ;;  %v246_v17 = vor.u32 %v284_v14, %v243_v15  ;;  %v285_v20 = vld [vmem:[#allocation5 + $0xc] sm:$0xf]  ;;  %185 = vmatpush.bf16.msra.mxu3 %v274_v12  ;;  %v250_v21 = vor.u32 %v287_v19, %v249_v18  ;;  %v251_v22 = vld [vmem:[#allocation5 + $0x1c] sm:$0xf0]  ;;  %v277_v23 = vld [vmem:[#allocation5 + $0x38] sm:$0xf] }
  0x14   :  { %v254_v24 = vor.u32 %v285_v20, %v251_v22  ;;  %v293_v25 = vld [vmem:[#allocation5 + $0x48] sm:$0xf0]  ;;  %v257_v26 = vld [vmem:[#allocation5 + $0x10] sm:$0xf]  ;;  %v288_v27 = vld [vmem:[#allocation5 + $0x20] sm:$0xf0] }
  0x15   :  { %147 = vmatpush.bf16.msra.mxu0 %v242_v16  ;;  %v59_v28 = vld [vmem:[#allocation2] sm:$0x1]  ;;  %vm136_vm0 = vcmask 261120   ;;  %v278_v29 = vor.u32 %v293_v25, %v277_v23  ;;  %v258_v30 = vor.u32 %v288_v27, %v257_v26  ;;  %v72_v31 = vld [vmem:[#allocation7] sm:$0x1f]  ;;  %vm212_vm1 = vcmask 1041408  }
  0x16   :  { %160 = vmatpush.bf16.msra.mxu1 %v246_v17  ;;  %v75_v33 = vperm.slane %v72_v31, 1  ;;  %v76_v35 = vperm.slane %v72_v31, 2  ;;  %v77_v37 = vperm.slane %v72_v31, 3  ;;  %v74_v38 = vperm.slane %v72_v31, 0  ;;  %s407_s0 = smov [#allocation8]   ;;  %s228_s30 = sshll.u32 %s443_s3, 4  ;;  %s229_s30 = int_to_ptr.hbm [resolvable:$true] %s228_s30 }
  0x17   :  { %173 = vmatpush.bf16.msra.mxu2 %v250_v21  ;;  %186 = vmatpush.bf16.msra.mxu3 %v254_v24  ;;  %vm214_vm2 = vcmask 1045508   ;;  %vm216_vm3 = vcmask 1043456   ;;  %v78_v51 = vperm.slane %v72_v31, 4  ;;  %s226_s2 = sshll.u32 %s407_s0, 4  ;;  %s227_s2 = int_to_ptr.vmem [resolvable:$true] %s226_s2 }
  0x18   :  { %279 = vmatmul.msk.bf16.vlgmr.msra.gmra.mxu0 %vm136_vm0, %v59_v28 }
  0x19   :  { %198 = vmatpush.bf16.msrb.mxu0 %v278_v29  ;;  %280 = vmatmul.msk.bf16.vlgmr.msra.gmra.mxu1 %vm136_vm0, %v59_v28 }
  0x1a   :  { %281 = vmatmul.msk.bf16.vlgmr.msra.gmra.mxu2 %vm136_vm0, %v59_v28  ;;  %282 = vmatmul.msk.bf16.vlgmr.msra.gmra.mxu3 %vm136_vm0, %v59_v28 }
  0x1d   :  { %199 = vmatpush.bf16.msrb.mxu0 %v258_v30 }
  0x28   :  { %283 = vmatmul.msk.bf16.vlgmr.msrb.gmra.mxu0 %vm136_vm0, %v59_v28 }
  0x95   :  { %v149_v32 = vpop.f32.mrf.mxu0 }
  0x96   :  { %v162_v34 = vpop.f32.mrf.mxu1  ;;  %v150_v47 = vadd.f32 %v149_v32, %v74_v38 }
  0x97   :  { %v163_v36 = vadd.f32 %v162_v34, %v75_v33 }
  0x99   :  { %v209_v43 = vrot.slane %v163_v36, 6 }
  0x9b   :  { %v213_v49 = vsel %vm212_vm1, %v150_v47, %v209_v43 }
  0x9d   :  { %v175_v39 = vpop.f32.mrf.mxu2  ;;  %v188_v41 = vpop.f32.mrf.mxu3 }
  0x9e   :  { %v176_v40 = vadd.f32 %v175_v39, %v76_v35  ;;  %v151_v42 = vpop.f32.mrf.mxu0  ;;  %v189_v44 = vadd.f32 %v188_v41, %v77_v37  ;;  %v164_v45 = vpop.f32.mrf.mxu1 }
  0xa0   :  { %v210_v46 = vrot.slane %v176_v40, 4  ;;  %v211_v48 = vrot.slane %v189_v44, 2 }
  0xa2   :  { %v215_v50 = vsel %vm214_vm2, %v210_v46, %v211_v48 }
  0xa3   :  { %v217_v52 = vsel %vm216_vm3, %v213_v49, %v215_v50 }
  0xa4   :  { %219 = vst [vmem:[#allocation8] sm:$0xff] %v217_v52 }
  0xa5   :  { %v177_v53 = vpop.f32.mrf.mxu2  ;;  %v190_v54 = vpop.f32.mrf.mxu3 }
  0xa6   :  { %v201_v55 = vpop.f32.mrf.mxu0 }
  0xa7   :  { %v202_v56 = vadd.f32 %v201_v55, %v78_v51 }
  0xa9   :  { %220 = vst [vmem:[#allocation8 + $0x8] sm:$0x3] %v202_v56 }
  0xaa   :  { %231 = dma.vmem_to_hbm [thread:$0]  %s227_s2, 160, %s229_s30, [#allocation4]  }
  0xae   :  { %v203_v57 = vpop.f32.mrf.mxu0 }
  0xaf   :  { %400 = dma.done.wait [#allocation4], 160  }
  0xb0   :  { %401 = vsyncadd [#allocation4], 4294967136 }
  0xb1   :  { %236 = vsyncpa [#allocation3], 1 }
  0xb2   :  { %237 = vsyncpa [#allocation6], 1 }
  0xb3   :  { %238 = vsyncpa [#allocation4], 1 }

</bundles_post_ra>
